<compile_context>
chip_gen: v5e
topology: v5e:2x2
jax: 0.10.0
libtpu: 0.0.40
codegen_flags: <defaults>
</compile_context>

<pallas_src>
import jax
import jax.numpy as jnp
from jax.experimental import pallas as pl
from jax.experimental.pallas import tpu as pltpu

INPUT_SIZE = 6
HIDDEN_SIZE = 500
OUTPUT_SIZE = 1

K_PAD = 8          # input features padded to one sublane group
H_PAD = 512        # hidden dim padded to a multiple of 128 lanes
BATCH_TILE = 512   # batch tile used once the batch is large enough to pipeline


def mlp_kernel(x_ref, w1_ref, b1_ref, w2_ref, b2_ref, o_ref):
    # Layer 1 on the MXU: (TB, 8) @ (8, 512) -> (TB, 512) with f32 accumulation.
    h = jnp.dot(x_ref[...], w1_ref[...], preferred_element_type=jnp.float32)
    h = jnp.maximum(h + b1_ref[...], 0.0)                     # bias + ReLU on the VPU
    # Layer 2 (512 -> 1): elementwise multiply (VPU slot) + cross-lane reduce (XLU slot);
    # cheaper than pushing an N=1 matmul through the MXU.
    y = jnp.sum(h * w2_ref[...], axis=-1, keepdims=True)      # (TB, 1)
    o_ref[...] = (y + b2_ref[0]).astype(o_ref.dtype)          # b2 is a scalar from SMEM
    # NOTE: for very large batches a lane-dense (1, TB) output layout would make the
    # writeback unmasked vst's; at (TB, 1) the store is masked but tiny vs. layer 1.


def _round_up(n, m):
    return ((n + m - 1) // m) * m


def prepare_params(w1, b1, w2, b2):
    """Zero-pad parameters once so the kernel only ever sees lane/sublane-aligned shapes."""
    w1_p = jnp.zeros((K_PAD, H_PAD), jnp.float32).at[:INPUT_SIZE, :HIDDEN_SIZE].set(w1)
    b1_p = jnp.zeros((1, H_PAD), jnp.float32).at[0, :HIDDEN_SIZE].set(b1)
    w2_row = jnp.zeros((1, H_PAD), jnp.float32).at[0, :HIDDEN_SIZE].set(w2[:, 0])
    b2_s = b2.reshape(1).astype(jnp.float32)                  # scalar -> SMEM
    return w1_p, b1_p, w2_row, b2_s


def neural_network_forward(x, w1_p, b1_p, w2_row, b2_s):
    """Pallas forward for Linear(6->500) -> ReLU -> Linear(500->1), padded params."""
    batch = x.shape[0]
    # Single grid step for small batches; tile (pipeline + megacore-split) large batches.
    tb = BATCH_TILE if batch >= BATCH_TILE else _round_up(batch, 8)
    batch_pad = _round_up(batch, tb)
    x_p = jnp.zeros((batch_pad, K_PAD), jnp.float32).at[:batch, :INPUT_SIZE].set(x)

    out = pl.pallas_call(
        mlp_kernel,
        out_shape=jax.ShapeDtypeStruct((batch_pad, OUTPUT_SIZE), jnp.float32),
        grid=(batch_pad // tb,),
        in_specs=[
            pl.BlockSpec((tb, K_PAD), lambda i: (i, 0)),        # x batch tile
            pl.BlockSpec((K_PAD, H_PAD), lambda i: (0, 0)),     # w1 (VMEM resident)
            pl.BlockSpec((1, H_PAD), lambda i: (0, 0)),         # b1 (VMEM resident)
            pl.BlockSpec((1, H_PAD), lambda i: (0, 0)),         # w2 row (VMEM resident)
            pl.BlockSpec(memory_space=pltpu.MemorySpace.SMEM),  # b2 scalar in SMEM
        ],
        out_specs=pl.BlockSpec((tb, OUTPUT_SIZE), lambda i: (i, 0)),
        compiler_params=pltpu.CompilerParams(
            dimension_semantics=("parallel",)),                 # batch tiles independent
    )(x_p, w1_p, b1_p, w2_row, b2_s)
    return out[:batch]


def init_params(key):
    """Deterministic init matching PyTorch nn.Linear default U[-1/sqrt(fan_in), 1/sqrt(fan_in)]."""
    k1, k2, k3, k4 = jax.random.split(key, 4)
    bound1 = 1.0 / jnp.sqrt(INPUT_SIZE)
    bound2 = 1.0 / jnp.sqrt(HIDDEN_SIZE)
    w1 = jax.random.uniform(k1, (INPUT_SIZE, HIDDEN_SIZE), jnp.float32, -bound1, bound1)
    b1 = jax.random.uniform(k2, (HIDDEN_SIZE,), jnp.float32, -bound1, bound1)
    w2 = jax.random.uniform(k3, (HIDDEN_SIZE, OUTPUT_SIZE), jnp.float32, -bound2, bound2)
    b2 = jax.random.uniform(k4, (OUTPUT_SIZE,), jnp.float32, -bound2, bound2)
    return w1, b1, w2, b2


if __name__ == "__main__":
    key = jax.random.PRNGKey(0)
    kx, kp = jax.random.split(key)
    batch = 8
    x = jax.random.normal(kx, (batch, INPUT_SIZE), jnp.float32)
    w1, b1, w2, b2 = init_params(kp)

    padded = prepare_params(w1, b1, w2, b2)
    out = neural_network_forward(x, *padded)
    out = jax.block_until_ready(out)

    # Reference check in plain JAX (same math, unpadded).
    ref = jnp.maximum(x @ w1 + b1, 0.0) @ w2 + b2
    assert out.shape == (batch, OUTPUT_SIZE)
    assert jnp.allclose(out, ref, atol=2e-5, rtol=2e-5), float(jnp.max(jnp.abs(out - ref)))
    print("KERNEL_OK")
</pallas_src>

<mosaic_0001>
module attributes {stable_mosaic.version = 11 : i64} {
  func.func @mlp_kernel(%arg0: i32, %arg1: memref<8x8xf32, #tpu.memory_space<vmem>>, %arg2: memref<8x512xf32, #tpu.memory_space<vmem>>, %arg3: memref<1x512xf32, #tpu.memory_space<vmem>>, %arg4: memref<1x512xf32, #tpu.memory_space<vmem>>, %arg5: memref<1xf32, #tpu.memory_space<smem>>, %arg6: memref<8x1xf32, #tpu.memory_space<vmem>>) attributes {dimension_semantics = [#tpu.dimension_semantics<parallel>], iteration_bounds = array<i64: 1>, scalar_prefetch = 0 : i64, scratch_operands = 0 : i64, tpu.core_type = #tpu.core_type<tc>, window_params = [{transform_indices = @transform_0, window_bounds = array<i64: 8, 8>}, {pipeline_mode = #tpu.pipeline_mode<synchronous>, transform_indices = @transform_1, window_bounds = array<i64: 8, 512>}, {pipeline_mode = #tpu.pipeline_mode<synchronous>, transform_indices = @transform_2, window_bounds = array<i64: 1, 512>}, {pipeline_mode = #tpu.pipeline_mode<synchronous>, transform_indices = @transform_3, window_bounds = array<i64: 1, 512>}, {transform_indices = @transform_4, window_bounds = array<i64: 1>}, {transform_indices = @transform_5, window_bounds = array<i64: 8, 1>}]} {
    %c0 = arith.constant 0 : index
    %c0_0 = arith.constant 0 : index
    %0 = vector.load %arg1[%c0, %c0_0] : memref<8x8xf32, #tpu.memory_space<vmem>>, vector<8x8xf32>
    %c0_1 = arith.constant 0 : index
    %c0_2 = arith.constant 0 : index
    %1 = vector.load %arg2[%c0_1, %c0_2] : memref<8x512xf32, #tpu.memory_space<vmem>>, vector<8x512xf32>
    %cst = arith.constant dense<0.000000e+00> : vector<8x512xf32>
    %2 = tpu.matmul %0, %1, %cst {dimension_numbers = #tpu.dot_dimension_numbers<[1], [0], [0], [1], [0, 0, 1, 1], [], []>} : vector<8x8xf32>, vector<8x512xf32>, vector<8x512xf32> -> vector<8x512xf32>
    %c0_3 = arith.constant 0 : index
    %c0_4 = arith.constant 0 : index
    %3 = vector.load %arg3[%c0_3, %c0_4] : memref<1x512xf32, #tpu.memory_space<vmem>>, vector<1x512xf32>
    %4 = vector.broadcast %3 : vector<1x512xf32> to vector<8x512xf32>
    %5 = arith.addf %2, %4 : vector<8x512xf32>
    %cst_5 = arith.constant 0.000000e+00 : f32
    %6 = vector.broadcast %cst_5 : f32 to vector<8x512xf32>
    %7 = arith.maximumf %5, %6 : vector<8x512xf32>
    %c0_6 = arith.constant 0 : index
    %c0_7 = arith.constant 0 : index
    %8 = vector.load %arg4[%c0_6, %c0_7] : memref<1x512xf32, #tpu.memory_space<vmem>>, vector<1x512xf32>
    %9 = vector.broadcast %8 : vector<1x512xf32> to vector<8x512xf32>
    %10 = arith.mulf %7, %9 : vector<8x512xf32>
    %cst_8 = arith.constant dense<0.000000e+00> : vector<8xf32>
    %11 = vector.multi_reduction <add>, %10, %cst_8 [1] : vector<8x512xf32> to vector<8xf32>
    %12 = vector.shape_cast %11 : vector<8xf32> to vector<8x1xf32>
    %c0_9 = arith.constant 0 : index
    %13 = memref.load %arg5[%c0_9] : memref<1xf32, #tpu.memory_space<smem>>
    %14 = vector.broadcast %13 : f32 to vector<8x1xf32>
    %15 = arith.addf %12, %14 : vector<8x1xf32>
    %c0_10 = arith.constant 0 : index
    %c0_11 = arith.constant 0 : index
    %16 = vector.load %arg6[%c0_10, %c0_11] : memref<8x1xf32, #tpu.memory_space<vmem>>, vector<8x1xf32>
    tpu.vector_store %arg6[%c0_10, %c0_11], %15 {strides = array<i32>} : memref<8x1xf32, #tpu.memory_space<vmem>>, vector<8x1xf32>,
    return
  }
  func.func @transform_0(%arg0: i32) -> (i32, i32) {
    %c0_i32 = arith.constant 0 : i32
    %c0_i32_0 = arith.constant 0 : i32
    return %arg0, %c0_i32 : i32, i32
  }
  func.func @transform_1(%arg0: i32) -> (i32, i32) {
    %c0_i32 = arith.constant 0 : i32
    %c0_i32_0 = arith.constant 0 : i32
    %c0_i32_1 = arith.constant 0 : i32
    return %c0_i32, %c0_i32_0 : i32, i32
  }
  func.func @transform_2(%arg0: i32) -> (i32, i32) {
    %c0_i32 = arith.constant 0 : i32
    %c0_i32_0 = arith.constant 0 : i32
    %c0_i32_1 = arith.constant 0 : i32
    return %c0_i32, %c0_i32_0 : i32, i32
  }
  func.func @transform_3(%arg0: i32) -> (i32, i32) {
    %c0_i32 = arith.constant 0 : i32
    %c0_i32_0 = arith.constant 0 : i32
    %c0_i32_1 = arith.constant 0 : i32
    return %c0_i32, %c0_i32_0 : i32, i32
  }
  func.func @transform_4(%arg0: i32) -> i32 {
    %c0_i32 = arith.constant 0 : i32
    %c0_i32_0 = arith.constant 0 : i32
    return %c0_i32 : i32
  }
  func.func @transform_5(%arg0: i32) -> (i32, i32) {
    %c0_i32 = arith.constant 0 : i32
    %c0_i32_0 = arith.constant 0 : i32
    return %arg0, %c0_i32 : i32, i32
  }
}

</mosaic_0001>

<bundles_post_ra>
// kernel: tpu_custom_call.1
= control target key start
LH: loop header
LB: loop body
LE: loop exit
PB: predicated region body
PF: predicated region fallthrough
CT: control target
= control target key end

     0   :  { %11 = vsyncpa [#allocation4], 0  ;;  %s329_s0 = inlined_call_operand.hbm [shape: f32[8,8], index: 0, kind: input, shape index: {}]   ;;  %s330_s1 = inlined_call_operand.hbm [shape: f32[8,512], index: 1, kind: input, shape index: {}]   ;;  %s331_s2 = inlined_call_operand.hbm [shape: f32[1,512], index: 2, kind: input, shape index: {}]   ;;  %s332_s3 = inlined_call_operand.vmem [shape: f32[1,512], index: 3, kind: input, shape index: {}]   ;;  %s333_s4 = inlined_call_operand.<no memory space> [shape: f32[1], index: 4, kind: input, shape index: {}]   ;;  %s334_s5 = inlined_call_operand.vmem [shape: f32[8,1], index: 5, kind: output, shape index: {}]  }
   0x1   :  { %12 = vsyncpa [#allocation6], 0  ;;  %s29_s20 = sshll.u32 %s330_s1, 4  ;;  %s278_s21 = smov [#allocation5]   ;;  %s30_s20 = int_to_ptr.hbm [resolvable:$true] %s29_s20 }
   0x2   :  { %s31_s22 = sshll.u32 %s278_s21, 4  ;;  %s18_s25 = sshll.u32 %s329_s0, 4  ;;  %s32_s22 = int_to_ptr.vmem [resolvable:$true] %s31_s22  ;;  %s19_s25 = int_to_ptr.hbm [resolvable:$true] %s18_s25 }
   0x3   :  { %34 = dma.hbm_to_vmem [thread:$0]  %s30_s20, 512, %s32_s22, [#allocation6]  }
   0x4   :  { %s279_s26 = smov [#allocation3]   ;;  %s40_s30 = sshll.u32 %s331_s2, 4  ;;  %s41_s30 = int_to_ptr.hbm [resolvable:$true] %s40_s30 }
   0x5   :  { %s20_s27 = sshll.u32 %s279_s26, 4  ;;  %s280_s1 = smov [#allocation7]   ;;  %s21_s27 = int_to_ptr.vmem [resolvable:$true] %s20_s27 }
   0x6   :  { %23 = dma.hbm_to_vmem [thread:$0]  %s19_s25, 128, %s21_s27, [#allocation4]  }
   0x7   :  { %s42_s6 = sshll.u32 %s280_s1, 4  ;;  %s43_s6 = int_to_ptr.vmem [resolvable:$true] %s42_s6 }
   0x8   :  { %45 = dma.hbm_to_vmem [thread:$0]  %s41_s30, 64, %s43_s6, [#allocation6]  }
   0x9   :  { %274 = dma.done.wait [#allocation4], 128  }
   0xa   :  { %275 = vsyncadd [#allocation4], 4294967168 }
   0xb   :  { %276 = dma.done.wait [#allocation6], 576  }
   0xc   :  { %277 = vsyncadd [#allocation6], 4294966720  ;;  %vm77_vm0 = vcmask 64512   ;;  %v65_v0 = vld [vmem:[#allocation5 + $0x10] sm:$0xff]  ;;  %v62_v1 = vld [vmem:[#allocation3] sm:$0xff]  ;;  %v185_v34 = vstv %s333_s4  ;;  %vm187_vm1 = vcmask 7168  }
   0xd   :  { %v66_v2 = vld [vmem:[#allocation5 + $0x18] sm:$0xff]  ;;  %136 = vmatpush.msra.mxu2 %v65_v0  ;;  %v63_v3 = vld [vmem:[#allocation5] sm:$0xff]  ;;  %v64_v4 = vld [vmem:[#allocation5 + $0x8] sm:$0xff] }
   0xe   :  { %156 = vmatpush.msra.mxu3 %v66_v2  ;;  %197 = vmatmul.msk.f32.vlgmr.msra.gmra.mxu2 %vm77_vm0, %v62_v1  ;;  %v67_v5 = vld [vmem:[#allocation7] sm:$0xf]  ;;  %v165_v7 = vld [vmem:[%s332_s3] sm:$0xf] }
   0xf   :  { %198 = vmatmul.msk.f32.vlgmr.msra.gmra.mxu3 %vm77_vm0, %v62_v1  ;;  %96 = vmatpush.msra.mxu0 %v63_v3  ;;  %v69_v6 = vperm.slane %v67_v5, 0  ;;  %v70_v8 = vperm.slane %v67_v5, 1  ;;  %v167_v10 = vperm.slane %v165_v7, 0  ;;  %v71_v12 = vperm.slane %v67_v5, 2 }
  0x10   :  { %116 = vmatpush.msra.mxu1 %v64_v4  ;;  %195 = vmatmul.msk.f32.vlgmr.msra.gmra.mxu0 %vm77_vm0, %v62_v1  ;;  %v168_v15 = vperm.slane %v165_v7, 1  ;;  %v72_v16 = vperm.slane %v67_v5, 3  ;;  %v169_v20 = vperm.slane %v165_v7, 2  ;;  %v170_v22 = vperm.slane %v165_v7, 3 }
  0x11   :  { %196 = vmatmul.msk.f32.vlgmr.msra.gmra.mxu1 %vm77_vm0, %v62_v1 }
  0x8d   :  { %v98_v9 = vpop.f32.mrf.mxu0 }
  0x8e   :  { %v118_v11 = vpop.f32.mrf.mxu1  ;;  %v99_v13 = vadd.f32 %v98_v9, %v69_v6 }
  0x8f   :  { %v119_v14 = vadd.f32 %v118_v11, %v70_v8 }
  0x90   :  { %v161_v17 = vmax.f32 %v99_v13, 0.0 }
  0x91   :  { %v162_v18 = vmax.f32 %v119_v14, 0.0  ;;  %v138_v19 = vpop.f32.mrf.mxu2 }
  0x92   :  { %v158_v21 = vpop.f32.mrf.mxu3  ;;  %v175_v23 = vmul.f32 %v167_v10, %v161_v17  ;;  %v139_v25 = vadd.f32 %v138_v19, %v71_v12 }
  0x93   :  { %v176_v24 = vmul.f32 %v168_v15, %v162_v18  ;;  %v159_v26 = vadd.f32 %v158_v21, %v72_v16 }
  0x94   :  { %v163_v27 = vmax.f32 %v139_v25, 0.0 }
  0x95   :  { %v164_v28 = vmax.f32 %v159_v26, 0.0  ;;  %v179_v29 = vadd.f32 %v176_v24, %v175_v23 }
  0x96   :  { %v177_v30 = vmul.f32 %v169_v20, %v163_v27 }
  0x97   :  { %v178_v31 = vmul.f32 %v170_v22, %v164_v28 }
  0x98   :  { %v180_v32 = vadd.f32 %v179_v29, %v177_v30 }
  0x9a   :  { %v181_v33 = vadd.f32 %v180_v32, %v178_v31 }
  0x9c   :  { %182 = vadd.xlane.f32.xlu0 %v181_v33 }
 0x10f   :  { %v183_v35 = vpop.xlane.xlu0 %182 }
 0x110   :  { %v186_v36 = vadd.f32 %v185_v34, %v183_v35 }
 0x112   :  { %188 = vst.msk [vmem:[%s334_s5] sm:$0xff] %vm187_vm1, %v186_v36 }
 0x113   :  { %193 = vsyncpa [#allocation4], 1 }
 0x114   :  { %194 = vsyncpa [#allocation6], 1 }

</bundles_post_ra>
